<compile_context>
chip_gen: v6e
topology: v6e:2x2x1
jax: 0.10.0
libtpu: 0.0.40
codegen_flags: <defaults>
</compile_context>

<pallas_src>
import jax
import jax.numpy as jnp
from jax.experimental import pallas as pl
from jax.experimental.pallas import tpu as pltpu

LANE = 128
SUBLANE_BF16 = 16


def _round_up(n, m):
    return ((n + m - 1) // m) * m


def _make_mlp_kernel(num_linear, activations):
    """Build the fused MLP kernel for `num_linear` Linear layers.

    Kernel signature: (x_ref, w1_ref, b1_ref, ..., wN_ref, bN_ref, o_ref).
    Matmul inputs are bf16 (MXU-native); accumulation, bias add and
    activations are f32; the final store is a lane-dense slab.
    """

    def kernel(x_ref, *refs):
        o_ref = refs[-1]
        h = x_ref[...]                                   # bf16 (TILE_B, in_feat)
        for li in range(num_linear):
            w_ref = refs[2 * li]
            b_ref = refs[2 * li + 1]
            acc = jnp.dot(h, w_ref[...],                 # bf16 x bf16 -> f32 acc (MXU)
                          preferred_element_type=jnp.float32)
            acc = acc + b_ref[...]                       # f32 bias (1, out) broadcast
            if li < num_linear - 1:
                acc = activations[li](acc)               # f32 activation (VPU/EUP)
                h = acc.astype(jnp.bfloat16)             # bf16 for the next MXU pass
            else:
                o_ref[...] = acc.astype(o_ref.dtype)     # lane-dense (TILE_B, 128k) store

    return kernel


def feed_forward_nn(x, params, activations, *, tile_b=512, out_dtype=jnp.float32):
    """x: [B, input_size] f32.

    params: list of (w, b) with w in (in, out) layout (torch weight transposed)
    and b of shape (1, out) or (out,).  activations: one JAX callable per
    hidden layer (len(params) - 1 of them).
    """
    B, in_features = x.shape
    num_linear = len(params)
    assert len(activations) == num_linear - 1, \
        "Number of activation functions must match the number of hidden layers."
    out_size = params[-1][0].shape[1]

    # Lane-dense output slab: pad output features to a multiple of 128 lanes.
    out_pad = _round_up(out_size, LANE)

    # Batch tiling: multiple of 16 sublanes (bf16 packing); pad batch to a tile multiple.
    tile_b = int(max(SUBLANE_BF16, min(tile_b, _round_up(B, SUBLANE_BF16))))
    tile_b = _round_up(tile_b, SUBLANE_BF16)
    padded_b = _round_up(B, tile_b)
    nb = padded_b // tile_b

    # bf16 input stream (halves HBM read traffic for x).
    x_p = x.astype(jnp.bfloat16)
    if padded_b != B:
        x_p = jnp.pad(x_p, ((0, padded_b - B), (0, 0)))

    flat_args = [x_p]
    in_specs = [pl.BlockSpec((tile_b, in_features), lambda i: (i, 0))]
    for li, (w, b) in enumerate(params):
        w = w.astype(jnp.bfloat16)                       # bf16 MXU weights
        b = b.astype(jnp.float32).reshape(1, -1)         # f32 bias, kept 2-D
        if li == num_linear - 1 and out_pad != out_size:
            # Zero-pad the last layer so the kernel writes a lane-dense output slab.
            w = jnp.pad(w, ((0, 0), (0, out_pad - out_size)))
            b = jnp.pad(b, ((0, 0), (0, out_pad - out_size)))
        flat_args += [w, b]
        # Constant index_map -> weights/biases DMA'd once, resident across batch tiles.
        in_specs += [pl.BlockSpec(w.shape, lambda i: (0, 0)),
                     pl.BlockSpec(b.shape, lambda i: (0, 0))]

    kernel = _make_mlp_kernel(num_linear, activations)

    out = pl.pallas_call(
        kernel,
        out_shape=jax.ShapeDtypeStruct((padded_b, out_pad), out_dtype),
        grid_spec=pltpu.PrefetchScalarGridSpec(
            num_scalar_prefetch=0,
            grid=(nb,),
            in_specs=in_specs,
            out_specs=pl.BlockSpec((tile_b, out_pad), lambda i: (i, 0)),
        ),
        compiler_params=pltpu.CompilerParams(
            dimension_semantics=("parallel",),   # shard batch tiles across TCs (v7x)
        ),
    )(*flat_args)

    return out[:B, :out_size]


def init_params(key, input_size, hidden_sizes, output_size):
    """Deterministic init mirroring nn.Linear (U(-1/sqrt(fan_in), 1/sqrt(fan_in))).
    Stored as (in, out) weights (torch weight transposed) and (1, out) biases, f32."""
    sizes = [input_size] + list(hidden_sizes) + [output_size]
    params = []
    for i in range(len(sizes) - 1):
        fan_in, fan_out = sizes[i], sizes[i + 1]
        key, kw, kb = jax.random.split(key, 3)
        bound = 1.0 / jnp.sqrt(jnp.float32(fan_in))
        w = jax.random.uniform(kw, (fan_in, fan_out), jnp.float32, -bound, bound)
        b = jax.random.uniform(kb, (1, fan_out), jnp.float32, -bound, bound)
        params.append((w, b))
    return params


def reference_mlp(x, params, activations):
    """Plain-JAX f32 reference of the same forward pass."""
    h = x
    for i, (w, b) in enumerate(params[:-1]):
        h = activations[i](h @ w + b)
    w, b = params[-1]
    return h @ w + b


if __name__ == "__main__":
    input_size = 16
    hidden_sizes = [32, 32]
    output_size = 8
    batch = 64

    activations = [lambda h: jnp.maximum(h, 0.0), jnp.tanh]  # relu, tanh

    key = jax.random.PRNGKey(0)
    key, kx = jax.random.split(key)
    x = jax.random.normal(kx, (batch, input_size), jnp.float32)
    params = init_params(key, input_size, hidden_sizes, output_size)

    # Small tile for the demo so the batch grid actually iterates (grid=(2,));
    # at realistic batch sizes the default tile_b=512 applies.
    out = feed_forward_nn(x, params, activations, tile_b=32)
    out = jax.block_until_ready(out)

    ref = reference_mlp(x, params, activations)
    assert out.shape == (batch, output_size), f"bad shape {out.shape}"
    max_err = float(jnp.max(jnp.abs(out - ref)))
    # bf16 matmul inputs (f32 accumulate) vs f32 reference -> loose tolerance.
    assert max_err < 3e-2, f"mismatch vs reference: max abs err {max_err}"

    print("KERNEL_OK")
</pallas_src>

<mosaic_0001>
module attributes {stable_mosaic.version = 11 : i64} {
  func.func @kernel(%arg0: i32, %arg1: memref<32x16xbf16, #tpu.memory_space<vmem>>, %arg2: memref<16x32xbf16, #tpu.memory_space<vmem>>, %arg3: memref<1x32xf32, #tpu.memory_space<vmem>>, %arg4: memref<32x32xbf16, #tpu.memory_space<vmem>>, %arg5: memref<1x32xf32, #tpu.memory_space<vmem>>, %arg6: memref<32x128xbf16, #tpu.memory_space<vmem>>, %arg7: memref<1x128xf32, #tpu.memory_space<vmem>>, %arg8: memref<32x128xf32, #tpu.memory_space<vmem>>) attributes {dimension_semantics = [#tpu.dimension_semantics<parallel>], iteration_bounds = array<i64: 2>, scalar_prefetch = 0 : i64, scratch_operands = 0 : i64, tpu.core_type = #tpu.core_type<tc>, window_params = [{transform_indices = @transform_0, window_bounds = array<i64: 32, 16>}, {pipeline_mode = #tpu.pipeline_mode<synchronous>, transform_indices = @transform_1, window_bounds = array<i64: 16, 32>}, {pipeline_mode = #tpu.pipeline_mode<synchronous>, transform_indices = @transform_2, window_bounds = array<i64: 1, 32>}, {pipeline_mode = #tpu.pipeline_mode<synchronous>, transform_indices = @transform_3, window_bounds = array<i64: 32, 32>}, {pipeline_mode = #tpu.pipeline_mode<synchronous>, transform_indices = @transform_4, window_bounds = array<i64: 1, 32>}, {pipeline_mode = #tpu.pipeline_mode<synchronous>, transform_indices = @transform_5, window_bounds = array<i64: 32, 128>}, {pipeline_mode = #tpu.pipeline_mode<synchronous>, transform_indices = @transform_6, window_bounds = array<i64: 1, 128>}, {transform_indices = @transform_7, window_bounds = array<i64: 32, 128>}]} {
    %c0 = arith.constant 0 : index
    %c0_0 = arith.constant 0 : index
    %0 = vector.load %arg1[%c0, %c0_0] : memref<32x16xbf16, #tpu.memory_space<vmem>>, vector<32x16xbf16>
    %c0_1 = arith.constant 0 : index
    %c0_2 = arith.constant 0 : index
    %1 = vector.load %arg2[%c0_1, %c0_2] : memref<16x32xbf16, #tpu.memory_space<vmem>>, vector<16x32xbf16>
    %cst = arith.constant dense<0.000000e+00> : vector<32x32xf32>
    %2 = tpu.matmul %0, %1, %cst {dimension_numbers = #tpu.dot_dimension_numbers<[1], [0], [0], [1], [0, 0, 1, 1], [], []>} : vector<32x16xbf16>, vector<16x32xbf16>, vector<32x32xf32> -> vector<32x32xf32>
    %c0_3 = arith.constant 0 : index
    %c0_4 = arith.constant 0 : index
    %3 = vector.load %arg3[%c0_3, %c0_4] : memref<1x32xf32, #tpu.memory_space<vmem>>, vector<1x32xf32>
    %4 = vector.broadcast %3 : vector<1x32xf32> to vector<32x32xf32>
    %5 = arith.addf %2, %4 : vector<32x32xf32>
    %cst_5 = arith.constant 0.000000e+00 : f32
    %6 = vector.broadcast %cst_5 : f32 to vector<32x32xf32>
    %7 = arith.maximumf %5, %6 : vector<32x32xf32>
    %8 = arith.truncf %7 : vector<32x32xf32> to vector<32x32xbf16>
    %c0_6 = arith.constant 0 : index
    %c0_7 = arith.constant 0 : index
    %9 = vector.load %arg4[%c0_6, %c0_7] : memref<32x32xbf16, #tpu.memory_space<vmem>>, vector<32x32xbf16>
    %cst_8 = arith.constant dense<0.000000e+00> : vector<32x32xf32>
    %10 = tpu.matmul %8, %9, %cst_8 {dimension_numbers = #tpu.dot_dimension_numbers<[1], [0], [0], [1], [0, 0, 1, 1], [], []>} : vector<32x32xbf16>, vector<32x32xbf16>, vector<32x32xf32> -> vector<32x32xf32>
    %c0_9 = arith.constant 0 : index
    %c0_10 = arith.constant 0 : index
    %11 = vector.load %arg5[%c0_9, %c0_10] : memref<1x32xf32, #tpu.memory_space<vmem>>, vector<1x32xf32>
    %12 = vector.broadcast %11 : vector<1x32xf32> to vector<32x32xf32>
    %13 = arith.addf %10, %12 : vector<32x32xf32>
    %14 = math.tanh %13 : vector<32x32xf32>
    %15 = arith.truncf %14 : vector<32x32xf32> to vector<32x32xbf16>
    %c0_11 = arith.constant 0 : index
    %c0_12 = arith.constant 0 : index
    %16 = vector.load %arg6[%c0_11, %c0_12] : memref<32x128xbf16, #tpu.memory_space<vmem>>, vector<32x128xbf16>
    %cst_13 = arith.constant dense<0.000000e+00> : vector<32x128xf32>
    %17 = tpu.matmul %15, %16, %cst_13 {dimension_numbers = #tpu.dot_dimension_numbers<[1], [0], [0], [1], [0, 0, 1, 1], [], []>} : vector<32x32xbf16>, vector<32x128xbf16>, vector<32x128xf32> -> vector<32x128xf32>
    %c0_14 = arith.constant 0 : index
    %c0_15 = arith.constant 0 : index
    %18 = vector.load %arg7[%c0_14, %c0_15] : memref<1x128xf32, #tpu.memory_space<vmem>>, vector<1x128xf32>
    %19 = vector.broadcast %18 : vector<1x128xf32> to vector<32x128xf32>
    %20 = arith.addf %17, %19 : vector<32x128xf32>
    %c0_16 = arith.constant 0 : index
    %c0_17 = arith.constant 0 : index
    %21 = vector.load %arg8[%c0_16, %c0_17] : memref<32x128xf32, #tpu.memory_space<vmem>>, vector<32x128xf32>
    tpu.vector_store %arg8[%c0_16, %c0_17], %20 {strides = array<i32>} : memref<32x128xf32, #tpu.memory_space<vmem>>, vector<32x128xf32>,
    return
  }
  func.func @transform_0(%arg0: i32) -> (i32, i32) {
    %c0_i32 = arith.constant 0 : i32
    %c0_i32_0 = arith.constant 0 : i32
    return %arg0, %c0_i32 : i32, i32
  }
  func.func @transform_1(%arg0: i32) -> (i32, i32) {
    %c0_i32 = arith.constant 0 : i32
    %c0_i32_0 = arith.constant 0 : i32
    %c0_i32_1 = arith.constant 0 : i32
    return %c0_i32, %c0_i32_0 : i32, i32
  }
  func.func @transform_2(%arg0: i32) -> (i32, i32) {
    %c0_i32 = arith.constant 0 : i32
    %c0_i32_0 = arith.constant 0 : i32
    %c0_i32_1 = arith.constant 0 : i32
    return %c0_i32, %c0_i32_0 : i32, i32
  }
  func.func @transform_3(%arg0: i32) -> (i32, i32) {
    %c0_i32 = arith.constant 0 : i32
    %c0_i32_0 = arith.constant 0 : i32
    %c0_i32_1 = arith.constant 0 : i32
    return %c0_i32, %c0_i32_0 : i32, i32
  }
  func.func @transform_4(%arg0: i32) -> (i32, i32) {
    %c0_i32 = arith.constant 0 : i32
    %c0_i32_0 = arith.constant 0 : i32
    %c0_i32_1 = arith.constant 0 : i32
    return %c0_i32, %c0_i32_0 : i32, i32
  }
  func.func @transform_5(%arg0: i32) -> (i32, i32) {
    %c0_i32 = arith.constant 0 : i32
    %c0_i32_0 = arith.constant 0 : i32
    %c0_i32_1 = arith.constant 0 : i32
    return %c0_i32, %c0_i32_0 : i32, i32
  }
  func.func @transform_6(%arg0: i32) -> (i32, i32) {
    %c0_i32 = arith.constant 0 : i32
    %c0_i32_0 = arith.constant 0 : i32
    %c0_i32_1 = arith.constant 0 : i32
    return %c0_i32, %c0_i32_0 : i32, i32
  }
  func.func @transform_7(%arg0: i32) -> (i32, i32) {
    %c0_i32 = arith.constant 0 : i32
    %c0_i32_0 = arith.constant 0 : i32
    return %arg0, %c0_i32 : i32, i32
  }
}

</mosaic_0001>

<bundles_post_ra>
// kernel: tpu_custom_call.1
= control target key start
LH: loop header
LB: loop body
LE: loop exit
PB: predicated region body
PF: predicated region fallthrough
CT: control target
= control target key end

     0   :  { %12 = vsyncpa [#allocation3], 0  ;;  %s967_s0 = inlined_call_operand.vmem [shape: bf16[64,16], index: 0, kind: input, shape index: {}]   ;;  %s968_s1 = inlined_call_operand.vmem [shape: bf16[16,32], index: 1, kind: input, shape index: {}]   ;;  %s969_s2 = inlined_call_operand.vmem [shape: f32[1,32], index: 2, kind: input, shape index: {}]   ;;  %s970_s3 = inlined_call_operand.vmem [shape: bf16[32,32], index: 3, kind: input, shape index: {}]   ;;  %s971_s4 = inlined_call_operand.vmem [shape: f32[1,32], index: 4, kind: input, shape index: {}]   ;;  %s972_s5 = inlined_call_operand.vmem [shape: bf16[32,128], index: 5, kind: input, shape index: {}]   ;;  %s973_s6 = inlined_call_operand.vmem [shape: f32[1,128], index: 6, kind: input, shape index: {}]   ;;  %s974_s7 = inlined_call_operand.hbm [shape: f32[64,128], index: 7, kind: output, shape index: {}]  }
   0x1   :  { %14 = vsyncpa [#allocation3 + $0x1], 0  ;;  %s838_s24 = smov 0   ;;  %s840_s25 = smov 0  }
   0x2   :  { %s842_s26 = smov 0   ;;  %s844_s27 = smov 0  }
   0x3 LB: > { %s859_s28 = sadd.s32 4294967295, %s793_s27   ;;  %s615_s29 = sadd.s32 4294967294, %s793_s27   ;;  %s793_s27 = sphi %s844_s27, %s980_s27   ;;  %s789_s26 = sphi %s842_s26, %s979_s26   ;;  %s785_s25 = sphi %s840_s25, %s978_s25   ;;  %s781_s24 = sphi %s838_s24, %s977_s24  }
   0x4   : > { %s863_s30 = sadd.s32 1, %s793_s27   ;;  %s179_s8 = sadd.s32 1, %s789_s26 }
   0x5   : > { %s176_s9 = ssub.s32 %s793_s27, %s863_s30  ;;  %p189_p0 = scmp.ne.s32.totalorder %s789_s26, %s785_s25 }
   0x6   : > { %p177_p1 = scmp.eq.s32.totalorder %s176_s9, 0  ;;  %p190_p2 = scmp.eq.s32.totalorder %s859_s28, 1 }
   0x7   : > { %p195_p3 = scmp.ne.s32.totalorder %s785_s25, %s781_s24  ;;  %p196_p4 = scmp.eq.s32.totalorder %s615_s29, 1 }
   0x8   : > { %s874_s10 = scalar_select %p177_p1, %s789_s26, %s179_s8  }
   0x9   : > { %p876_p5 = por %p190_p2, %p189_p0  ;;  %p880_p6 = por %p196_p4, %p195_p3 }
   0xa   : > { %p618_p7 = scmp.ge.s32.totalorder %s793_s27, 1  ;;  %p241_p8 = scmp.lt.s32.totalorder %s793_s27, 3 }
   0xc   : > { %p242_p9 = pnand %p618_p7, %p241_p8 }
   0xd   : > { %s620_s15 = sshll.u32 (!%p242_p9), %s859_s28, 2  ;;  %s270_s18 = sand.u32 (!%p242_p9), 1, %s785_s25  }
   0xe   : > { %245 = sbr.rel (%p242_p9) target bundleno = 663 (0x297), region = 48  ;;  %p274_p10 = scmp.lt.s32.totalorder (!%p242_p9), %s620_s15, 7 }
   0xf   : > { %s643_s29 = sshll.u32 (!%p242_p9), %s859_s28, 9  ;;  %s927_s14 = scalar_lea.sflag (!%p242_p9), [#allocation3], %s270_s18 }
  0x10   : > { %s925_s13 = scalar_lea.hbm (!%p242_p9), %s974_s7, %s643_s29 }
  0x13   : > { %v718_v0 = vld [vmem:[%s968_s1] sm:$0xff]   ;;  %s982_s15 = smov (!%p274_p10, %s620_s15), 7  ;;  %vm310_vm0 = vcmask 130048   ;;  %v721_v3 = vld [vmem:[%s970_s3 + $0x8] sm:$0xff]   ;;  %vm395_vm1 = vcmask 261120  }
  0x14   : > { %655 = vmatprep.subr.bf16.mxu0 %v718_v0  ;;  %s621_s16 = sshll.u32 %s982_s15, 2  ;;  %661 = vmatprep.subr.bf16.mxu1 %v721_v3  ;;  %v722_v4 = vld [vmem:[%s970_s3] sm:$0xff]   ;;  %v723_v20 = vld [vmem:[%s972_s5 + $0x8] sm:$0xff]   ;;  %s795_s15 = smov [#allocation2]  }
  0x15   : > { %656 = vmatpush3.bf16.msra.mxu0 %v718_v0  ;;  %s277_s19 = scalar_lea.vmem %s967_s0, %s621_s16  ;;  %662 = vmatpush3.bf16.msra.mxu1 %v721_v3  ;;  %v622_v7 = vld [vmem:[%s969_s2] ss:$0 sm:$0xff]  ;;  %s737_s16 = sshll.u32 %s795_s15, 4  ;;  %s738_s16 = int_to_ptr.vmem [resolvable:$false] %s737_s16 }
  0x16   : > { %v719_v1 = vld [vmem:[%s277_s19] sm:$0xff]   ;;  %v720_v2 = vld [vmem:[%s277_s19 + $0x8] sm:$0xff]   ;;  %663 = vmatprep.subr.bf16.mxu1 %v722_v4  ;;  %669 = vmatprep.subr.bf16.mxu0 %v723_v20  ;;  %s619_s19 = sshll.u32 %s270_s18, 5  ;;  %s739_s17 = scalar_lea.vmem %s738_s16, 1024 }
  0x17   : > { %657 = vmatprep.mubr.msk.bf16.mxu0 %vm310_vm0, %v719_v1  ;;  %v724_v21 = vld [vmem:[%s972_s5] sm:$0xff]   ;;  %s272_s22 = scalar_lea.vmem [#allocation2], %s619_s19 }
  0x18   : > { %658 = vmatmul.mubr.msk.bf16.vlgmr.msra.gmra.mxu0 %vm310_vm0, %v720_v2  ;;  %v628_v23 = vld [vmem:[%s971_s4] ss:$0 sm:$0xff]  ;;  %s553_s23 = sshll.u32 %s272_s22, 4  ;;  %s920_s23 = int_to_ptr.vmem [resolvable:$true] %s553_s23 }
  0x19   : > { %664 = vmatpush3.bf16.msra.mxu1 %v722_v4  ;;  %670 = vmatpush3.bf16.msra.mxu0 %v723_v20  ;;  %v633_v37 = vld [vmem:[%s973_s6] ss:$0 sm:$0xff]  ;;  %s733_s28 = scalar_lea.vmem %s920_s23, 512  ;;  %p740_p0 = scmp.lt.s32.totalorder %s920_s23, %s738_s16 }
  0x1a   : > { %671 = vmatprep.subr.bf16.mxu0 %v724_v21  ;;  %p734_p11 = scmp.ne.s32.totalorder %s920_s23, %s733_s28  ;;  %p741_p1 = scmp.lt.s32.totalorder %s739_s17, %s733_s28 }
  0x1c   : > { %p735_p12 = pnand %p734_p11, %p876_p5  ;;  %p742_p2 = por %p741_p1, %p740_p0 }
  0x1d   : > { %672 = vmatpush3.bf16.msra.mxu0 %v724_v21 }
  0x1e   : > { %p736_p13 = pneg %p735_p12 }
  0x20   : > { %p743_p3 = pnand %p742_p2, %p736_p13 }
  0xd8   : > { %v659_v5 = vpop.f32.mrf.mxu0 }
  0xd9   : > { %v360_v11 = vadd.f32 %v659_v5, %v622_v7 }
  0xda   : > { %v351_v6 = vpop.f32.mrf.mxu0 }
  0xdb   : > { %v352_v9 = vadd.f32 %v622_v7, %v351_v6  ;;  %v368_v17 = vmax.f32 %v360_v11, 0.0 }
  0xdc   : > { %v660_v8 = vpop.f32.mrf.mxu0 }
  0xdd   : > { %v363_v10 = vadd.f32 %v660_v8, %v622_v7  ;;  %v366_v15 = vmax.f32 %v352_v9, 0.0 }
  0xde   : > { %v354_v12 = vpop.f32.mrf.mxu0 }
  0xdf   : > { %v355_v13 = vadd.f32 %v622_v7, %v354_v12  ;;  %v369_v14 = vmax.f32 %v363_v10, 0.0 }
  0xe1   : > { %v367_v16 = vmax.f32 %v355_v13, 0.0  ;;  %v371_v19 = vpack.c.bf16 %v369_v14, %v368_v17 }
  0xe3   : > { %v370_v18 = vpack.c.bf16 %v367_v16, %v366_v15 }
  0xe5   : > { %665 = vmatprep.mubr.msk.bf16.mxu1 %vm395_vm1, %v370_v18 }
  0xe6   : > { %666 = vmatmul.mubr.msk.bf16.vlgmr.msra.gmra.mxu1 %vm395_vm1, %v371_v19 }
 0x1a6   : > { %v667_v22 = vpop.f32.mrf.mxu1 }
 0x1a7   : > { %v445_v28 = vadd.f32 %v667_v22, %v628_v23 }
 0x1a8   : > { %v436_v24 = vpop.f32.mrf.mxu1 }
 0x1a9   : > { %v437_v25 = vadd.f32 %v628_v23, %v436_v24 }
 0x1aa   : > { %v668_v26 = vpop.f32.mrf.mxu1 }
 0x1ab   : > { %v448_v27 = vadd.f32 %v668_v26, %v628_v23  ;;  %725 = vtanh.f32 %v437_v25 }
 0x1ac   : > { %v439_v29 = vpop.f32.mrf.mxu1 }
 0x1ad   : > { %v440_v30 = vadd.f32 %v628_v23, %v439_v29  ;;  %727 = vtanh.f32 %v448_v27 }
 0x1af   : > { %729 = vtanh.f32 %v440_v30 }
 0x1b0   : > { %731 = vtanh.f32 %v445_v28 }
 0x1b8   : > { %v726_v31 = vpop.eup %725 }
 0x1ba   : > { %v728_v32 = vpop.eup %727 }
 0x1bc   : > { %v730_v33 = vpop.eup %729 }
 0x1bd   : > { %v732_v34 = vpop.eup %731  ;;  %v455_v35 = vpack.c.bf16 %v730_v33, %v726_v31 }
 0x1be   : > { %v456_v36 = vpack.c.bf16 %v728_v32, %v732_v34 }
 0x1bf   : > { %673 = vmatprep.mubr.msk.bf16.mxu0 %vm395_vm1, %v455_v35 }
 0x1c0   : > { %674 = vmatmul.mubr.msk.bf16.vlgmr.msra.gmra.mxu0 %vm395_vm1, %v456_v36 }
 0x280   : > { %v675_v38 = vpop.f32.mrf.mxu0 }
 0x281   : > { %v529_v39 = vadd.f32 %v675_v38, %v633_v37 }
 0x282   : > { %v520_v40 = vpop.f32.mrf.mxu0 }
 0x283   : > { %537 = vst [vmem:[%s272_s22 + $0x10] sm:$0xff] %v529_v39  ;;  %v521_v41 = vadd.f32 %v633_v37, %v520_v40 }
 0x284   : > { %v676_v42 = vpop.f32.mrf.mxu0 }
 0x285   : > { %535 = vst [vmem:[%s272_s22] sm:$0xff] %v521_v41  ;;  %v532_v43 = vadd.f32 %v676_v42, %v633_v37 }
 0x286   : > { %v523_v44 = vpop.f32.mrf.mxu0 }
 0x287   : > { %538 = vst [vmem:[%s272_s22 + $0x18] sm:$0xff] %v532_v43  ;;  %v524_v45 = vadd.f32 %v633_v37, %v523_v44 }
 0x289   : > { %536 = vst [vmem:[%s272_s22 + $0x8] sm:$0xff] %v524_v45 }
 0x28a   : > { %746 = shalt.err (!%p743_p3)
}
 0x28b   : > { %s747_s18 = scalar_lea.hbm %s925_s13, 512  ;;  %s751_s21 = scalar_lea.hbm %s974_s7, 1024 }
 0x28c   : > { %p748_p4 = scmp.ne.s32.totalorder %s925_s13, %s747_s18  ;;  %p752_p9 = scmp.lt.s32.totalorder %s925_s13, %s974_s7 }
 0x28d   : > { %p753_p10 = scmp.lt.s32.totalorder %s751_s21, %s747_s18 }
 0x28e   : > { %p749_p7 = pnand %p748_p4, %p876_p5 }
 0x28f   : > { %p754_p11 = por %p753_p10, %p752_p9 }
 0x290   : > { %p750_p8 = pneg %p749_p7 }
 0x292   : > { %p755_p12 = pnand %p754_p11, %p750_p8 }
 0x294   : > { %758 = shalt.err (!%p755_p12)
}
 0x295   : > { %s796_s8 = smov 128   ;;  %s797_s9 = smov 8  }
 0x296   : > { %677 = dma.vmem_to_hbm [thread:$0]  (%p876_p5), %s920_s23, 512, %s925_s13, %s927_s14, %s796_s8, %s796_s8, %s797_s9  }
 0x297 PF: > { %p683_p13 = scmp.ge.s32.totalorder %s793_s27, 2  ;;  %s568_s28 = sand.u32 1, %s781_s24  }
 0x298   : > { %s569_s15 = scalar_lea.sflag [#allocation3], %s568_s28 }
 0x299   : > { %p680_p0 = pnand %p683_p13, %p880_p6 }
 0x29b   : > { %p681_p1 = pneg %p680_p0 }
 0x29d   : > { %776 = dma.done.wait (%p681_p1), %s569_s15, 512  }
 0x29e   : > { %778 = vsyncadd (%p681_p1), %s569_s15, 4294966784  ;;  %p17_p2 = scmp.ge.s32.totalorder %s863_s30, 4   ;;  %s977_s24 = smov %s785_s25 }
 0x29f   : > { %s978_s25 = smov %s789_s26  ;;  %s979_s26 = smov %s874_s10 }
 0x2a0   : > { %s980_s27 = smov %s863_s30  ;;  %19 = sbr.rel (!%p17_p2) target bundleno = 3 (0x3), region = 83 }
 0x2a5   :  { %574 = vsyncpa [#allocation3], 1 }
 0x2a6   :  { %576 = vsyncpa [#allocation3 + $0x1], 1 }

</bundles_post_ra>
